<compile_context>
chip_gen: v7x
topology: tpu7x:2x2x1
jax: 0.10.0
libtpu: 0.0.40
codegen_flags: <defaults>
</compile_context>

<pallas_src>
import math
from functools import partial

import jax
import jax.numpy as jnp
from jax import lax
from jax.experimental import pallas as pl
from jax.experimental.pallas import tpu as pltpu

LN_EPS = 1e-5  # PyTorch nn.LayerNorm default


def _layernorm(z, g, b):
    mu = jnp.mean(z, axis=-1, keepdims=True)
    var = jnp.mean((z - mu) ** 2, axis=-1, keepdims=True)
    return (z - mu) * lax.rsqrt(var + LN_EPS) * g + b


def _gelu_exact(x):
    # nn.GELU() default = exact erf formulation (kept for semantic fidelity)
    return 0.5 * x * (1.0 + lax.erf(x * (1.0 / math.sqrt(2.0))))


def transformer_layer_kernel(
    x_ref,
    ln1g_ref, ln1b_ref,
    wq_ref, wk_ref, wv_ref,
    wo_ref, bo_ref,
    ln2g_ref, ln2b_ref,
    w1_ref, b1_ref,
    w2_ref, b2_ref,
    o_ref,
    *, heads, scale,
):
    l = pl.program_id(1)  # depth (innermost, "arbitrary") grid axis

    # Layer 0: seed the resident activation block from the input.
    @pl.when(l == 0)
    def _():
        o_ref[0] = x_ref[0]

    x = o_ref[0].astype(jnp.float32)          # (n, dim) resident activation
    n, dim = x.shape

    # ---------------- Residual(PreNorm(Attention)) ----------------
    xn = _layernorm(x, ln1g_ref[0], ln1b_ref[0])                    # fp32
    xb = jnp.broadcast_to(xn.astype(jnp.bfloat16)[None], (heads, n, dim))

    proj_dn = (((2,), (1,)), ((0,), (0,)))    # contract dim, batch over heads
    q = lax.dot_general(xb, wq_ref[0], proj_dn, preferred_element_type=jnp.float32)  # (h, n, d)
    k = lax.dot_general(xb, wk_ref[0], proj_dn, preferred_element_type=jnp.float32)
    v = lax.dot_general(xb, wv_ref[0], proj_dn, preferred_element_type=jnp.float32)

    # scores: (h, n, n) — single batched contraction, no per-head loop / concat
    dots = lax.dot_general(
        q.astype(jnp.bfloat16), k.astype(jnp.bfloat16),
        (((2,), (2,)), ((0,), (0,))),
        preferred_element_type=jnp.float32) * scale
    dots = dots - jnp.max(dots, axis=-1, keepdims=True)
    e = jnp.exp(dots)
    attn = e * pl.reciprocal(jnp.sum(e, axis=-1, keepdims=True), approx=True)

    # context: (h, n, d)
    ctx = lax.dot_general(
        attn.astype(jnp.bfloat16), v.astype(jnp.bfloat16),
        (((2,), (1,)), ((0,), (0,))),
        preferred_element_type=jnp.float32)

    # output projection as head-batched matmul + reduction over heads
    # (equivalent to concat(heads) @ Wo, but avoids lane-concat relayouts)
    outh = lax.dot_general(
        ctx.astype(jnp.bfloat16), wo_ref[0],
        (((2,), (1,)), ((0,), (0,))),
        preferred_element_type=jnp.float32)                          # (h, n, dim)
    x1 = x + jnp.sum(outh, axis=0) + bo_ref[0]

    # ---------------- Residual(PreNorm(FeedForward)) ----------------
    xn2 = _layernorm(x1, ln2g_ref[0], ln2b_ref[0])
    h1 = jnp.dot(xn2.astype(jnp.bfloat16), w1_ref[0],
                 preferred_element_type=jnp.float32) + b1_ref[0]
    h1 = _gelu_exact(h1)
    ff = jnp.dot(h1.astype(jnp.bfloat16), w2_ref[0],
                 preferred_element_type=jnp.float32) + b2_ref[0]

    o_ref[0] = (x1 + ff).astype(o_ref.dtype)


def transformer_forward_pallas(x, p, heads):
    b, n, dim = x.shape
    depth = p["wq"].shape[0]
    d = dim // heads
    mlp_dim = p["w1"].shape[2]
    scale = dim ** (-0.5)   # matches the module (scale uses full dim, not head dim)

    xmap = lambda i, l: (i, 0, 0)        # per-batch activation block (constant across depth)
    lmap3 = lambda i, l: (l, 0, 0)       # per-layer param blocks (streamed along depth)
    lmap4 = lambda i, l: (l, 0, 0, 0)

    in_specs = [
        pl.BlockSpec((1, n, dim), xmap),                 # x (only read at l == 0)
        pl.BlockSpec((1, 1, dim), lmap3),                # ln1 gamma
        pl.BlockSpec((1, 1, dim), lmap3),                # ln1 beta
        pl.BlockSpec((1, heads, dim, d), lmap4),         # Wq (bf16)
        pl.BlockSpec((1, heads, dim, d), lmap4),         # Wk (bf16)
        pl.BlockSpec((1, heads, dim, d), lmap4),         # Wv (bf16)
        pl.BlockSpec((1, heads, d, dim), lmap4),         # Wo (bf16)
        pl.BlockSpec((1, 1, dim), lmap3),                # bo
        pl.BlockSpec((1, 1, dim), lmap3),                # ln2 gamma
        pl.BlockSpec((1, 1, dim), lmap3),                # ln2 beta
        pl.BlockSpec((1, dim, mlp_dim), lmap3),          # W1 (bf16)
        pl.BlockSpec((1, 1, mlp_dim), lmap3),            # b1
        pl.BlockSpec((1, mlp_dim, dim), lmap3),          # W2 (bf16)
        pl.BlockSpec((1, 1, dim), lmap3),                # b2
    ]

    return pl.pallas_call(
        partial(transformer_layer_kernel, heads=heads, scale=scale),
        out_shape=jax.ShapeDtypeStruct((b, n, dim), x.dtype),
        grid=(b, depth),
        in_specs=in_specs,
        out_specs=pl.BlockSpec((1, n, dim), xmap),       # resident accumulator across depth
        compiler_params=pltpu.CompilerParams(
            dimension_semantics=("parallel", "arbitrary"),
            vmem_limit_bytes=48 * 1024 * 1024,           # explicit VMEM budget (v7x-safe)
        ),
    )(
        x,
        p["ln1_g"], p["ln1_b"],
        p["wq"], p["wk"], p["wv"],
        p["wo"], p["bo"],
        p["ln2_g"], p["ln2_b"],
        p["w1"], p["b1"],
        p["w2"], p["b2"],
    )


# ----------------------- pure-JAX reference (precision-matched) -----------------------
def transformer_reference(x, p, heads):
    depth = p["wq"].shape[0]
    dim = x.shape[-1]
    scale = dim ** (-0.5)
    bf16 = jnp.bfloat16
    f32 = jnp.float32
    for l in range(depth):
        xn = _layernorm(x, p["ln1_g"][l], p["ln1_b"][l])
        xb = xn.astype(bf16)
        q = jnp.einsum("bnd,hdk->bhnk", xb, p["wq"][l], preferred_element_type=f32)
        k = jnp.einsum("bnd,hdk->bhnk", xb, p["wk"][l], preferred_element_type=f32)
        v = jnp.einsum("bnd,hdk->bhnk", xb, p["wv"][l], preferred_element_type=f32)
        dots = jnp.einsum("bhnk,bhmk->bhnm", q.astype(bf16), k.astype(bf16),
                          preferred_element_type=f32) * scale
        attn = jax.nn.softmax(dots, axis=-1)
        ctx = jnp.einsum("bhnm,bhmk->bhnk", attn.astype(bf16), v.astype(bf16),
                         preferred_element_type=f32)
        out = jnp.einsum("bhnk,hkd->bnd", ctx.astype(bf16), p["wo"][l],
                         preferred_element_type=f32) + p["bo"][l]
        x = x + out
        xn2 = _layernorm(x, p["ln2_g"][l], p["ln2_b"][l])
        h1 = jnp.einsum("bnd,df->bnf", xn2.astype(bf16), p["w1"][l],
                        preferred_element_type=f32) + p["b1"][l]
        h1 = _gelu_exact(h1)
        ff = jnp.einsum("bnf,fd->bnd", h1.astype(bf16), p["w2"][l],
                        preferred_element_type=f32) + p["b2"][l]
        x = x + ff
    return x


# ----------------------- deterministic parameter construction -----------------------
def make_params(key, depth, dim, heads, mlp_dim):
    d = dim // heads
    ks = jax.random.split(key, 7)
    bf16 = jnp.bfloat16

    wqkv = 0.05 * jax.random.normal(ks[0], (depth, dim, 3 * dim), jnp.float32)

    def head_split(w):  # (depth, dim, dim) -> (depth, heads, dim, d)
        return jnp.transpose(w.reshape(depth, dim, heads, d), (0, 2, 1, 3))

    wq = head_split(wqkv[..., 0 * dim:1 * dim]).astype(bf16)
    wk = head_split(wqkv[..., 1 * dim:2 * dim]).astype(bf16)
    wv = head_split(wqkv[..., 2 * dim:3 * dim]).astype(bf16)

    wo = 0.05 * jax.random.normal(ks[1], (depth, dim, dim), jnp.float32)
    wo_h = wo.reshape(depth, heads, d, dim).astype(bf16)   # rows grouped by head

    return dict(
        ln1_g=jnp.ones((depth, 1, dim), jnp.float32),
        ln1_b=jnp.zeros((depth, 1, dim), jnp.float32),
        wq=wq, wk=wk, wv=wv,
        wo=wo_h,
        bo=0.05 * jax.random.normal(ks[2], (depth, 1, dim), jnp.float32),
        ln2_g=jnp.ones((depth, 1, dim), jnp.float32),
        ln2_b=jnp.zeros((depth, 1, dim), jnp.float32),
        w1=(0.05 * jax.random.normal(ks[3], (depth, dim, mlp_dim), jnp.float32)).astype(bf16),
        b1=0.05 * jax.random.normal(ks[4], (depth, 1, mlp_dim), jnp.float32),
        w2=(0.05 * jax.random.normal(ks[5], (depth, mlp_dim, dim), jnp.float32)).astype(bf16),
        b2=0.05 * jax.random.normal(ks[6], (depth, 1, dim), jnp.float32),
    )


if __name__ == "__main__":
    # Small shapes: batch=2, seq=8, dim=32, heads=4, mlp_dim=64, depth=2, dropout=0.0
    B, N, DIM, HEADS, MLP_DIM, DEPTH = 2, 8, 32, 4, 64, 2

    key = jax.random.PRNGKey(0)
    kx, kp = jax.random.split(key)
    x = jax.random.normal(kx, (B, N, DIM), jnp.float32)
    params = make_params(kp, DEPTH, DIM, HEADS, MLP_DIM)

    out = transformer_forward_pallas(x, params, HEADS)
    out = jax.block_until_ready(out)

    ref = transformer_reference(x, params, HEADS)
    assert out.shape == (B, N, DIM)
    assert jnp.allclose(out, ref, rtol=1e-2, atol=1e-2), "Pallas output mismatch vs reference"

    print("KERNEL_OK")
</pallas_src>

<mosaic_0001>
module attributes {stable_mosaic.version = 11 : i64} {
  func.func @transformer_layer_kernel(%arg0: i32, %arg1: i32, %arg2: memref<1x8x32xf32, #tpu.memory_space<vmem>>, %arg3: memref<1x1x32xf32, #tpu.memory_space<vmem>>, %arg4: memref<1x1x32xf32, #tpu.memory_space<vmem>>, %arg5: memref<1x4x32x8xbf16, #tpu.memory_space<vmem>>, %arg6: memref<1x4x32x8xbf16, #tpu.memory_space<vmem>>, %arg7: memref<1x4x32x8xbf16, #tpu.memory_space<vmem>>, %arg8: memref<1x4x8x32xbf16, #tpu.memory_space<vmem>>, %arg9: memref<1x1x32xf32, #tpu.memory_space<vmem>>, %arg10: memref<1x1x32xf32, #tpu.memory_space<vmem>>, %arg11: memref<1x1x32xf32, #tpu.memory_space<vmem>>, %arg12: memref<1x32x64xbf16, #tpu.memory_space<vmem>>, %arg13: memref<1x1x64xf32, #tpu.memory_space<vmem>>, %arg14: memref<1x64x32xbf16, #tpu.memory_space<vmem>>, %arg15: memref<1x1x32xf32, #tpu.memory_space<vmem>>, %arg16: memref<1x8x32xf32, #tpu.memory_space<vmem>>) attributes {dimension_semantics = [#tpu.dimension_semantics<parallel>, #tpu.dimension_semantics<arbitrary>], iteration_bounds = array<i64: 2, 2>, scalar_prefetch = 0 : i64, scratch_operands = 0 : i64, tpu.core_type = #tpu.core_type<tc>, window_params = [{transform_indices = @transform_0, window_bounds = array<i64: 1, 8, 32>}, {transform_indices = @transform_1, window_bounds = array<i64: 1, 1, 32>}, {transform_indices = @transform_2, window_bounds = array<i64: 1, 1, 32>}, {transform_indices = @transform_3, window_bounds = array<i64: 1, 4, 32, 8>}, {transform_indices = @transform_4, window_bounds = array<i64: 1, 4, 32, 8>}, {transform_indices = @transform_5, window_bounds = array<i64: 1, 4, 32, 8>}, {transform_indices = @transform_6, window_bounds = array<i64: 1, 4, 8, 32>}, {transform_indices = @transform_7, window_bounds = array<i64: 1, 1, 32>}, {transform_indices = @transform_8, window_bounds = array<i64: 1, 1, 32>}, {transform_indices = @transform_9, window_bounds = array<i64: 1, 1, 32>}, {transform_indices = @transform_10, window_bounds = array<i64: 1, 32, 64>}, {transform_indices = @transform_11, window_bounds = array<i64: 1, 1, 64>}, {transform_indices = @transform_12, window_bounds = array<i64: 1, 64, 32>}, {transform_indices = @transform_13, window_bounds = array<i64: 1, 1, 32>}, {transform_indices = @transform_14, window_bounds = array<i64: 1, 8, 32>}]} {
    %c0_i32 = arith.constant 0 : i32
    %0 = arith.cmpi eq, %arg1, %c0_i32 : i32
    %1 = arith.extui %0 : i1 to i32
    %c0_i32_0 = arith.constant 0 : i32
    %2 = arith.cmpi ne, %1, %c0_i32_0 : i32
    scf.if %2 {
      %c0_73 = arith.constant 0 : index
      %c0_74 = arith.constant 0 : index
      %c0_75 = arith.constant 0 : index
      %126 = vector.load %arg2[%c0_73, %c0_74, %c0_75] : memref<1x8x32xf32, #tpu.memory_space<vmem>>, vector<1x8x32xf32>
      %127 = vector.shape_cast %126 : vector<1x8x32xf32> to vector<8x32xf32>
      %c0_76 = arith.constant 0 : index
      %c0_77 = arith.constant 0 : index
      %c0_78 = arith.constant 0 : index
      %128 = vector.load %arg16[%c0_76, %c0_77, %c0_78] : memref<1x8x32xf32, #tpu.memory_space<vmem>>, vector<1x8x32xf32>
      %129 = vector.shape_cast %128 : vector<1x8x32xf32> to vector<8x32xf32>
      %130 = vector.shape_cast %127 : vector<8x32xf32> to vector<1x8x32xf32>
      tpu.vector_store %arg16[%c0_76, %c0_77, %c0_78], %130 {strides = array<i32>} : memref<1x8x32xf32, #tpu.memory_space<vmem>>, vector<1x8x32xf32>,
    } else {
    }
    %c0 = arith.constant 0 : index
    %c0_1 = arith.constant 0 : index
    %c0_2 = arith.constant 0 : index
    %3 = vector.load %arg16[%c0, %c0_1, %c0_2] : memref<1x8x32xf32, #tpu.memory_space<vmem>>, vector<1x8x32xf32>
    %4 = vector.shape_cast %3 : vector<1x8x32xf32> to vector<8x32xf32>
    %c0_3 = arith.constant 0 : index
    %c0_4 = arith.constant 0 : index
    %c0_5 = arith.constant 0 : index
    %5 = vector.load %arg3[%c0_3, %c0_4, %c0_5] : memref<1x1x32xf32, #tpu.memory_space<vmem>>, vector<1x1x32xf32>
    %6 = vector.shape_cast %5 : vector<1x1x32xf32> to vector<1x32xf32>
    %c0_6 = arith.constant 0 : index
    %c0_7 = arith.constant 0 : index
    %c0_8 = arith.constant 0 : index
    %7 = vector.load %arg4[%c0_6, %c0_7, %c0_8] : memref<1x1x32xf32, #tpu.memory_space<vmem>>, vector<1x1x32xf32>
    %8 = vector.shape_cast %7 : vector<1x1x32xf32> to vector<1x32xf32>
    %cst = arith.constant dense<0.000000e+00> : vector<8xf32>
    %9 = vector.multi_reduction <add>, %4, %cst [1] : vector<8x32xf32> to vector<8xf32>
    %10 = vector.shape_cast %9 : vector<8xf32> to vector<8x1xf32>
    %cst_9 = arith.constant 3.200000e+01 : f32
    %11 = vector.broadcast %cst_9 : f32 to vector<8x1xf32>
    %12 = arith.divf %10, %11 : vector<8x1xf32>
    %13 = vector.broadcast %12 : vector<8x1xf32> to vector<8x32xf32>
    %14 = arith.subf %4, %13 : vector<8x32xf32>
    %15 = arith.mulf %14, %14 : vector<8x32xf32>
    %cst_10 = arith.constant dense<0.000000e+00> : vector<8xf32>
    %16 = vector.multi_reduction <add>, %15, %cst_10 [1] : vector<8x32xf32> to vector<8xf32>
    %17 = vector.shape_cast %16 : vector<8xf32> to vector<8x1xf32>
    %cst_11 = arith.constant 3.200000e+01 : f32
    %18 = vector.broadcast %cst_11 : f32 to vector<8x1xf32>
    %19 = arith.divf %17, %18 : vector<8x1xf32>
    %20 = vector.broadcast %12 : vector<8x1xf32> to vector<8x32xf32>
    %21 = arith.subf %4, %20 : vector<8x32xf32>
    %cst_12 = arith.constant 9.99999974E-6 : f32
    %22 = vector.broadcast %cst_12 : f32 to vector<8x1xf32>
    %23 = arith.addf %19, %22 : vector<8x1xf32>
    %24 = math.rsqrt %23 : vector<8x1xf32>
    %25 = vector.broadcast %24 : vector<8x1xf32> to vector<8x32xf32>
    %26 = arith.mulf %21, %25 : vector<8x32xf32>
    %27 = vector.broadcast %6 : vector<1x32xf32> to vector<8x32xf32>
    %28 = arith.mulf %26, %27 : vector<8x32xf32>
    %29 = vector.broadcast %8 : vector<1x32xf32> to vector<8x32xf32>
    %30 = arith.addf %28, %29 : vector<8x32xf32>
    %31 = arith.truncf %30 : vector<8x32xf32> to vector<8x32xbf16>
    %32 = vector.shape_cast %31 : vector<8x32xbf16> to vector<1x8x32xbf16>
    %33 = vector.shape_cast %32 : vector<1x8x32xbf16> to vector<1x8x32xbf16>
    %34 = vector.broadcast %33 : vector<1x8x32xbf16> to vector<4x8x32xbf16>
    %c0_13 = arith.constant 0 : index
    %c0_14 = arith.constant 0 : index
    %c0_15 = arith.constant 0 : index
    %c0_16 = arith.constant 0 : index
    %35 = vector.load %arg5[%c0_13, %c0_14, %c0_15, %c0_16] : memref<1x4x32x8xbf16, #tpu.memory_space<vmem>>, vector<1x4x32x8xbf16>
    %36 = vector.shape_cast %35 : vector<1x4x32x8xbf16> to vector<4x32x8xbf16>
    %cst_17 = arith.constant dense<0.000000e+00> : vector<4x8x8xf32>
    %37 = tpu.matmul %34, %36, %cst_17 {dimension_numbers = #tpu.dot_dimension_numbers<[2], [1], [1], [2], [0, 0, 0, 1, 1, 2], [0], [0]>} : vector<4x8x32xbf16>, vector<4x32x8xbf16>, vector<4x8x8xf32> -> vector<4x8x8xf32>
    %c0_18 = arith.constant 0 : index
    %c0_19 = arith.constant 0 : index
    %c0_20 = arith.constant 0 : index
    %c0_21 = arith.constant 0 : index
    %38 = vector.load %arg6[%c0_18, %c0_19, %c0_20, %c0_21] : memref<1x4x32x8xbf16, #tpu.memory_space<vmem>>, vector<1x4x32x8xbf16>
    %39 = vector.shape_cast %38 : vector<1x4x32x8xbf16> to vector<4x32x8xbf16>
    %cst_22 = arith.constant dense<0.000000e+00> : vector<4x8x8xf32>
    %40 = tpu.matmul %34, %39, %cst_22 {dimension_numbers = #tpu.dot_dimension_numbers<[2], [1], [1], [2], [0, 0, 0, 1, 1, 2], [0], [0]>} : vector<4x8x32xbf16>, vector<4x32x8xbf16>, vector<4x8x8xf32> -> vector<4x8x8xf32>
    %c0_23 = arith.constant 0 : index
    %c0_24 = arith.constant 0 : index
    %c0_25 = arith.constant 0 : index
    %c0_26 = arith.constant 0 : index
    %41 = vector.load %arg7[%c0_23, %c0_24, %c0_25, %c0_26] : memref<1x4x32x8xbf16, #tpu.memory_space<vmem>>, vector<1x4x32x8xbf16>
    %42 = vector.shape_cast %41 : vector<1x4x32x8xbf16> to vector<4x32x8xbf16>
    %cst_27 = arith.constant dense<0.000000e+00> : vector<4x8x8xf32>
    %43 = tpu.matmul %34, %42, %cst_27 {dimension_numbers = #tpu.dot_dimension_numbers<[2], [1], [1], [2], [0, 0, 0, 1, 1, 2], [0], [0]>} : vector<4x8x32xbf16>, vector<4x32x8xbf16>, vector<4x8x8xf32> -> vector<4x8x8xf32>
    %44 = arith.truncf %37 : vector<4x8x8xf32> to vector<4x8x8xbf16>
    %45 = arith.truncf %40 : vector<4x8x8xf32> to vector<4x8x8xbf16>
    %cst_28 = arith.constant dense<0.000000e+00> : vector<4x8x8xf32>
    %46 = tpu.matmul %44, %45, %cst_28 {dimension_numbers = #tpu.dot_dimension_numbers<[2], [2], [1], [1], [0, 0, 0, 1, 1, 1], [0], [0]>} : vector<4x8x8xbf16>, vector<4x8x8xbf16>, vector<4x8x8xf32> -> vector<4x8x8xf32>
    %cst_29 = arith.constant 0.176776692 : f32
    %47 = vector.broadcast %cst_29 : f32 to vector<4x8x8xf32>
    %48 = arith.mulf %46, %47 : vector<4x8x8xf32>
    %cst_30 = arith.constant dense<0xFF800000> : vector<4x8xf32>
    %49 = vector.multi_reduction <maximumf>, %48, %cst_30 [2] : vector<4x8x8xf32> to vector<4x8xf32>
    %50 = vector.shape_cast %49 : vector<4x8xf32> to vector<4x8x1xf32>
    %51 = vector.broadcast %50 : vector<4x8x1xf32> to vector<4x8x8xf32>
    %52 = arith.subf %48, %51 : vector<4x8x8xf32>
    %53 = math.exp %52 : vector<4x8x8xf32>
    %cst_31 = arith.constant dense<0.000000e+00> : vector<4x8xf32>
    %54 = vector.multi_reduction <add>, %53, %cst_31 [2] : vector<4x8x8xf32> to vector<4x8xf32>
    %55 = vector.shape_cast %54 : vector<4x8xf32> to vector<4x8x1xf32>
    %56 = tpu.reciprocal %55 {approx = true} : vector<4x8x1xf32> -> vector<4x8x1xf32>
    %57 = vector.broadcast %56 : vector<4x8x1xf32> to vector<4x8x8xf32>
    %58 = arith.mulf %53, %57 : vector<4x8x8xf32>
    %59 = arith.truncf %58 : vector<4x8x8xf32> to vector<4x8x8xbf16>
    %60 = arith.truncf %43 : vector<4x8x8xf32> to vector<4x8x8xbf16>
    %cst_32 = arith.constant dense<0.000000e+00> : vector<4x8x8xf32>
    %61 = tpu.matmul %59, %60, %cst_32 {dimension_numbers = #tpu.dot_dimension_numbers<[2], [1], [1], [2], [0, 0, 0, 1, 1, 2], [0], [0]>} : vector<4x8x8xbf16>, vector<4x8x8xbf16>, vector<4x8x8xf32> -> vector<4x8x8xf32>
    %62 = arith.truncf %61 : vector<4x8x8xf32> to vector<4x8x8xbf16>
    %c0_33 = arith.constant 0 : index
    %c0_34 = arith.constant 0 : index
    %c0_35 = arith.constant 0 : index
    %c0_36 = arith.constant 0 : index
    %63 = vector.load %arg8[%c0_33, %c0_34, %c0_35, %c0_36] : memref<1x4x8x32xbf16, #tpu.memory_space<vmem>>, vector<1x4x8x32xbf16>
    %64 = vector.shape_cast %63 : vector<1x4x8x32xbf16> to vector<4x8x32xbf16>
    %cst_37 = arith.constant dense<0.000000e+00> : vector<4x8x32xf32>
    %65 = tpu.matmul %62, %64, %cst_37 {dimension_numbers = #tpu.dot_dimension_numbers<[2], [1], [1], [2], [0, 0, 0, 1, 1, 2], [0], [0]>} : vector<4x8x8xbf16>, vector<4x8x32xbf16>, vector<4x8x32xf32> -> vector<4x8x32xf32>
    %cst_38 = arith.constant dense<0.000000e+00> : vector<8x32xf32>
    %66 = vector.multi_reduction <add>, %65, %cst_38 [0] : vector<4x8x32xf32> to vector<8x32xf32>
    %67 = arith.addf %4, %66 : vector<8x32xf32>
    %c0_39 = arith.constant 0 : index
    %c0_40 = arith.constant 0 : index
    %c0_41 = arith.constant 0 : index
    %68 = vector.load %arg9[%c0_39, %c0_40, %c0_41] : memref<1x1x32xf32, #tpu.memory_space<vmem>>, vector<1x1x32xf32>
    %69 = vector.shape_cast %68 : vector<1x1x32xf32> to vector<1x32xf32>
    %70 = vector.broadcast %69 : vector<1x32xf32> to vector<8x32xf32>
    %71 = arith.addf %67, %70 : vector<8x32xf32>
    %c0_42 = arith.constant 0 : index
    %c0_43 = arith.constant 0 : index
    %c0_44 = arith.constant 0 : index
    %72 = vector.load %arg10[%c0_42, %c0_43, %c0_44] : memref<1x1x32xf32, #tpu.memory_space<vmem>>, vector<1x1x32xf32>
    %73 = vector.shape_cast %72 : vector<1x1x32xf32> to vector<1x32xf32>
    %c0_45 = arith.constant 0 : index
    %c0_46 = arith.constant 0 : index
    %c0_47 = arith.constant 0 : index
    %74 = vector.load %arg11[%c0_45, %c0_46, %c0_47] : memref<1x1x32xf32, #tpu.memory_space<vmem>>, vector<1x1x32xf32>
    %75 = vector.shape_cast %74 : vector<1x1x32xf32> to vector<1x32xf32>
    %cst_48 = arith.constant dense<0.000000e+00> : vector<8xf32>
    %76 = vector.multi_reduction <add>, %71, %cst_48 [1] : vector<8x32xf32> to vector<8xf32>
    %77 = vector.shape_cast %76 : vector<8xf32> to vector<8x1xf32>
    %cst_49 = arith.constant 3.200000e+01 : f32
    %78 = vector.broadcast %cst_49 : f32 to vector<8x1xf32>
    %79 = arith.divf %77, %78 : vector<8x1xf32>
    %80 = vector.broadcast %79 : vector<8x1xf32> to vector<8x32xf32>
    %81 = arith.subf %71, %80 : vector<8x32xf32>
    %82 = arith.mulf %81, %81 : vector<8x32xf32>
    %cst_50 = arith.constant dense<0.000000e+00> : vector<8xf32>
    %83 = vector.multi_reduction <add>, %82, %cst_50 [1] : vector<8x32xf32> to vector<8xf32>
    %84 = vector.shape_cast %83 : vector<8xf32> to vector<8x1xf32>
    %cst_51 = arith.constant 3.200000e+01 : f32
    %85 = vector.broadcast %cst_51 : f32 to vector<8x1xf32>
    %86 = arith.divf %84, %85 : vector<8x1xf32>
    %87 = vector.broadcast %79 : vector<8x1xf32> to vector<8x32xf32>
    %88 = arith.subf %71, %87 : vector<8x32xf32>
    %cst_52 = arith.constant 9.99999974E-6 : f32
    %89 = vector.broadcast %cst_52 : f32 to vector<8x1xf32>
    %90 = arith.addf %86, %89 : vector<8x1xf32>
    %91 = math.rsqrt %90 : vector<8x1xf32>
    %92 = vector.broadcast %91 : vector<8x1xf32> to vector<8x32xf32>
    %93 = arith.mulf %88, %92 : vector<8x32xf32>
    %94 = vector.broadcast %73 : vector<1x32xf32> to vector<8x32xf32>
    %95 = arith.mulf %93, %94 : vector<8x32xf32>
    %96 = vector.broadcast %75 : vector<1x32xf32> to vector<8x32xf32>
    %97 = arith.addf %95, %96 : vector<8x32xf32>
    %98 = arith.truncf %97 : vector<8x32xf32> to vector<8x32xbf16>
    %c0_53 = arith.constant 0 : index
    %c0_54 = arith.constant 0 : index
    %c0_55 = arith.constant 0 : index
    %99 = vector.load %arg12[%c0_53, %c0_54, %c0_55] : memref<1x32x64xbf16, #tpu.memory_space<vmem>>, vector<1x32x64xbf16>
    %100 = vector.shape_cast %99 : vector<1x32x64xbf16> to vector<32x64xbf16>
    %cst_56 = arith.constant dense<0.000000e+00> : vector<8x64xf32>
    %101 = tpu.matmul %98, %100, %cst_56 {dimension_numbers = #tpu.dot_dimension_numbers<[1], [0], [0], [1], [0, 0, 1, 1], [], []>} : vector<8x32xbf16>, vector<32x64xbf16>, vector<8x64xf32> -> vector<8x64xf32>
    %c0_57 = arith.constant 0 : index
    %c0_58 = arith.constant 0 : index
    %c0_59 = arith.constant 0 : index
    %102 = vector.load %arg13[%c0_57, %c0_58, %c0_59] : memref<1x1x64xf32, #tpu.memory_space<vmem>>, vector<1x1x64xf32>
    %103 = vector.shape_cast %102 : vector<1x1x64xf32> to vector<1x64xf32>
    %104 = vector.broadcast %103 : vector<1x64xf32> to vector<8x64xf32>
    %105 = arith.addf %101, %104 : vector<8x64xf32>
    %cst_60 = arith.constant 5.000000e-01 : f32
    %106 = vector.broadcast %cst_60 : f32 to vector<8x64xf32>
    %107 = arith.mulf %106, %105 : vector<8x64xf32>
    %cst_61 = arith.constant 0.707106769 : f32
    %108 = vector.broadcast %cst_61 : f32 to vector<8x64xf32>
    %109 = arith.mulf %105, %108 : vector<8x64xf32>
    %110 = math.erf %109 : vector<8x64xf32>
    %cst_62 = arith.constant 1.000000e+00 : f32
    %111 = vector.broadcast %cst_62 : f32 to vector<8x64xf32>
    %112 = arith.addf %111, %110 : vector<8x64xf32>
    %113 = arith.mulf %107, %112 : vector<8x64xf32>
    %114 = arith.truncf %113 : vector<8x64xf32> to vector<8x64xbf16>
    %c0_63 = arith.constant 0 : index
    %c0_64 = arith.constant 0 : index
    %c0_65 = arith.constant 0 : index
    %115 = vector.load %arg14[%c0_63, %c0_64, %c0_65] : memref<1x64x32xbf16, #tpu.memory_space<vmem>>, vector<1x64x32xbf16>
    %116 = vector.shape_cast %115 : vector<1x64x32xbf16> to vector<64x32xbf16>
    %cst_66 = arith.constant dense<0.000000e+00> : vector<8x32xf32>
    %117 = tpu.matmul %114, %116, %cst_66 {dimension_numbers = #tpu.dot_dimension_numbers<[1], [0], [0], [1], [0, 0, 1, 1], [], []>} : vector<8x64xbf16>, vector<64x32xbf16>, vector<8x32xf32> -> vector<8x32xf32>
    %c0_67 = arith.constant 0 : index
    %c0_68 = arith.constant 0 : index
    %c0_69 = arith.constant 0 : index
    %118 = vector.load %arg15[%c0_67, %c0_68, %c0_69] : memref<1x1x32xf32, #tpu.memory_space<vmem>>, vector<1x1x32xf32>
    %119 = vector.shape_cast %118 : vector<1x1x32xf32> to vector<1x32xf32>
    %120 = vector.broadcast %119 : vector<1x32xf32> to vector<8x32xf32>
    %121 = arith.addf %117, %120 : vector<8x32xf32>
    %122 = arith.addf %71, %121 : vector<8x32xf32>
    %c0_70 = arith.constant 0 : index
    %c0_71 = arith.constant 0 : index
    %c0_72 = arith.constant 0 : index
    %123 = vector.load %arg16[%c0_70, %c0_71, %c0_72] : memref<1x8x32xf32, #tpu.memory_space<vmem>>, vector<1x8x32xf32>
    %124 = vector.shape_cast %123 : vector<1x8x32xf32> to vector<8x32xf32>
    %125 = vector.shape_cast %122 : vector<8x32xf32> to vector<1x8x32xf32>
    tpu.vector_store %arg16[%c0_70, %c0_71, %c0_72], %125 {strides = array<i32>} : memref<1x8x32xf32, #tpu.memory_space<vmem>>, vector<1x8x32xf32>,
    return
  }
  func.func @transform_0(%arg0: i32, %arg1: i32) -> (i32, i32, i32) {
    %c0_i32 = arith.constant 0 : i32
    %c0_i32_0 = arith.constant 0 : i32
    %c0_i32_1 = arith.constant 0 : i32
    return %arg0, %c0_i32, %c0_i32_0 : i32, i32, i32
  }
  func.func @transform_1(%arg0: i32, %arg1: i32) -> (i32, i32, i32) {
    %c0_i32 = arith.constant 0 : i32
    %c0_i32_0 = arith.constant 0 : i32
    %c0_i32_1 = arith.constant 0 : i32
    return %arg1, %c0_i32, %c0_i32_0 : i32, i32, i32
  }
  func.func @transform_2(%arg0: i32, %arg1: i32) -> (i32, i32, i32) {
    %c0_i32 = arith.constant 0 : i32
    %c0_i32_0 = arith.constant 0 : i32
    %c0_i32_1 = arith.constant 0 : i32
    return %arg1, %c0_i32, %c0_i32_0 : i32, i32, i32
  }
  func.func @transform_3(%arg0: i32, %arg1: i32) -> (i32, i32, i32, i32) {
    %c0_i32 = arith.constant 0 : i32
    %c0_i32_0 = arith.constant 0 : i32
    %c0_i32_1 = arith.constant 0 : i32
    %c0_i32_2 = arith.constant 0 : i32
    return %arg1, %c0_i32, %c0_i32_0, %c0_i32_1 : i32, i32, i32, i32
  }
  func.func @transform_4(%arg0: i32, %arg1: i32) -> (i32, i32, i32, i32) {
    %c0_i32 = arith.constant 0 : i32
    %c0_i32_0 = arith.constant 0 : i32
    %c0_i32_1 = arith.constant 0 : i32
    %c0_i32_2 = arith.constant 0 : i32
    return %arg1, %c0_i32, %c0_i32_0, %c0_i32_1 : i32, i32, i32, i32
  }
  func.func @transform_5(%arg0: i32, %arg1: i32) -> (i32, i32, i32, i32) {
    %c0_i32 = arith.constant 0 : i32
    %c0_i32_0 = arith.constant 0 : i32
    %c0_i32_1 = arith.constant 0 : i32
    %c0_i32_2 = arith.constant 0 : i32
    return %arg1, %c0_i32, %c0_i32_0, %c0_i32_1 : i32, i32, i32, i32
  }
  func.func @transform_6(%arg0: i32, %arg1: i32) -> (i32, i32, i32, i32) {
    %c0_i32 = arith.constant 0 : i32
    %c0_i32_0 = arith.constant 0 : i32
    %c0_i32_1 = arith.constant 0 : i32
    %c0_i32_2 = arith.constant 0 : i32
    return %arg1, %c0_i32, %c0_i32_0, %c0_i32_1 : i32, i32, i32, i32
  }
  func.func @transform_7(%arg0: i32, %arg1: i32) -> (i32, i32, i32) {
    %c0_i32 = arith.constant 0 : i32
    %c0_i32_0 = arith.constant 0 : i32
    %c0_i32_1 = arith.constant 0 : i32
    return %arg1, %c0_i32, %c0_i32_0 : i32, i32, i32
  }
  func.func @transform_8(%arg0: i32, %arg1: i32) -> (i32, i32, i32) {
    %c0_i32 = arith.constant 0 : i32
    %c0_i32_0 = arith.constant 0 : i32
    %c0_i32_1 = arith.constant 0 : i32
    return %arg1, %c0_i32, %c0_i32_0 : i32, i32, i32
  }
  func.func @transform_9(%arg0: i32, %arg1: i32) -> (i32, i32, i32) {
    %c0_i32 = arith.constant 0 : i32
    %c0_i32_0 = arith.constant 0 : i32
    %c0_i32_1 = arith.constant 0 : i32
    return %arg1, %c0_i32, %c0_i32_0 : i32, i32, i32
  }
  func.func @transform_10(%arg0: i32, %arg1: i32) -> (i32, i32, i32) {
    %c0_i32 = arith.constant 0 : i32
    %c0_i32_0 = arith.constant 0 : i32
    %c0_i32_1 = arith.constant 0 : i32
    return %arg1, %c0_i32, %c0_i32_0 : i32, i32, i32
  }
  func.func @transform_11(%arg0: i32, %arg1: i32) -> (i32, i32, i32) {
    %c0_i32 = arith.constant 0 : i32
    %c0_i32_0 = arith.constant 0 : i32
    %c0_i32_1 = arith.constant 0 : i32
    return %arg1, %c0_i32, %c0_i32_0 : i32, i32, i32
  }
  func.func @transform_12(%arg0: i32, %arg1: i32) -> (i32, i32, i32) {
    %c0_i32 = arith.constant 0 : i32
    %c0_i32_0 = arith.constant 0 : i32
    %c0_i32_1 = arith.constant 0 : i32
    return %arg1, %c0_i32, %c0_i32_0 : i32, i32, i32
  }
  func.func @transform_13(%arg0: i32, %arg1: i32) -> (i32, i32, i32) {
    %c0_i32 = arith.constant 0 : i32
    %c0_i32_0 = arith.constant 0 : i32
    %c0_i32_1 = arith.constant 0 : i32
    return %arg1, %c0_i32, %c0_i32_0 : i32, i32, i32
  }
  func.func @transform_14(%arg0: i32, %arg1: i32) -> (i32, i32, i32) {
    %c0_i32 = arith.constant 0 : i32
    %c0_i32_0 = arith.constant 0 : i32
    %c0_i32_1 = arith.constant 0 : i32
    return %arg0, %c0_i32, %c0_i32_0 : i32, i32, i32
  }
}

</mosaic_0001>

<bundles_post_ra>
// kernel: tpu_custom_call.1
= control target key start
LH: loop header
LB: loop body
LE: loop exit
PB: predicated region body
PF: predicated region fallthrough
CT: control target
= control target key end

     0   :  { %s3565_s0 = inlined_call_operand.vmem [shape: f32[2,8,32], index: 0, kind: input, shape index: {}]   ;;  %s3566_s1 = inlined_call_operand.vmem [shape: f32[2,1,32], index: 1, kind: input, shape index: {}]   ;;  %s3567_s2 = inlined_call_operand.vmem [shape: f32[2,1,32], index: 2, kind: input, shape index: {}]   ;;  %s3568_s3 = inlined_call_operand.vmem [shape: bf16[2,4,32,8], index: 3, kind: input, shape index: {}]   ;;  %s3569_s4 = inlined_call_operand.vmem [shape: bf16[2,4,32,8], index: 4, kind: input, shape index: {}]   ;;  %s3570_s5 = inlined_call_operand.vmem [shape: bf16[2,4,32,8], index: 5, kind: input, shape index: {}]   ;;  %s3571_s6 = inlined_call_operand.vmem [shape: bf16[2,4,8,32], index: 6, kind: input, shape index: {}]   ;;  %s3572_s7 = inlined_call_operand.vmem [shape: f32[2,1,32], index: 7, kind: input, shape index: {}]   ;;  %s3573_s8 = inlined_call_operand.vmem [shape: f32[2,1,32], index: 8, kind: input, shape index: {}]   ;;  %s3574_s9 = inlined_call_operand.vmem [shape: f32[2,1,32], index: 9, kind: input, shape index: {}]   ;;  %s3575_s10 = inlined_call_operand.vmem [shape: bf16[2,32,64], index: 10, kind: input, shape index: {}]   ;;  %s3576_s11 = inlined_call_operand.vmem [shape: f32[2,1,64], index: 11, kind: input, shape index: {}]   ;;  %s3577_s12 = inlined_call_operand.vmem [shape: bf16[2,64,32], index: 12, kind: input, shape index: {}]   ;;  %s3578_s13 = inlined_call_operand.vmem [shape: f32[2,1,32], index: 13, kind: input, shape index: {}]   ;;  %s3579_s14 = inlined_call_operand.hbm [shape: f32[2,8,32], index: 14, kind: output, shape index: {}]  }
   0x1   :  { %3596 = sst [smem:[#allocation19_spill]] %s3565_s0 }
   0x2   :  { %3597 = sst [smem:[#allocation20_spill]] %s3568_s3 }
   0x3   :  { %3598 = sst [smem:[#allocation21_spill]] %s3569_s4 }
   0x4   :  { %3599 = sst [smem:[#allocation22_spill]] %s3570_s5 }
   0x5   :  { %3600 = sst [smem:[#allocation23_spill]] %s3571_s6 }
   0x6   :  { %3601 = sst [smem:[#allocation24_spill]] %s3573_s8 }
   0x7   :  { %3602 = sst [smem:[#allocation25_spill]] %s3577_s12 }
   0x8   :  { %3603 = sst [smem:[#allocation26_spill]] %s3579_s14 }
   0x9   :  { %19 = vsyncpa [#allocation3], 0 }
   0xa   :  { %21 = vsyncpa [#allocation3 + $0x1], 0  ;;  %s3105_s29 = smov 0   ;;  %s3107_s30 = smov 0  }
   0xb   :  { %s3109_s15 = smov 0   ;;  %s3111_s16 = smov 0  }
   0xc   :  { %s3113_s17 = smov 0   ;;  %s3115_s18 = smov 0  }
   0xd   :  { %s3117_s19 = smov 0   ;;  %s3119_s20 = smov 0  }
   0xe LB: > { %3604 = sst [smem:[#allocation5_spill]] %s2997_s29  ;;  %s2457_s21 = sadd.s32 4294967295, %s3025_s20   ;;  %s3025_s20 = sphi %s3119_s20, %s27_s20   ;;  %s3021_s19 = sphi %s3117_s19, %s3649_s19   ;;  %s3017_s18 = sphi %s3115_s18, %s3648_s18   ;;  %s3013_s17 = sphi %s3113_s17, %s3647_s17   ;;  %s3009_s16 = sphi %s3111_s16, %s3646_s16   ;;  %s3005_s15 = sphi %s3109_s15, %s3645_s15   ;;  %s3001_s30 = sphi %s3107_s30, %s3644_s30   ;;  %s2997_s29 = sphi %s3105_s29, %s3643_s29  }
   0xf   : > { %3605 = sst [smem:[#allocation6_spill]] %s3001_s30  ;;  %s2458_s22 = sadd.s32 4294967294, %s3025_s20  }
  0x10   : > { %3606 = sst [smem:[#allocation7_spill]] %s3005_s15  ;;  %s36_s23 = sadd.s32 1, %s3017_s18 }
  0x11   : > { %3607 = sst [smem:[#allocation8_spill]] %s3009_s16  ;;  %p37_p0 = scmp.ge.s32.totalorder %s36_s23, 2 }
  0x12   : > { %3608 = sst [smem:[#allocation9_spill]] %s3013_s17  ;;  %s39_s24 = sadd.s32 1, %s3021_s19 }
  0x13   : > { %3609 = sst [smem:[#allocation10_spill]] %s3017_s18  ;;  %p420_p1 = scmp.ne.s32.totalorder %s3005_s15, %s3001_s30 }
  0x14   : > { %3610 = sst [smem:[#allocation11_spill]] %s3021_s19  ;;  %p421_p2 = scmp.eq.s32.totalorder %s2457_s21, 3 }
  0x15   : > { %3611 = sst [smem:[#allocation12_spill]] %s3025_s20  ;;  %s3651_s23 = smov (%p37_p0, %s36_s23), 0 }
  0x16   : > { %3612 = sst [smem:[#allocation13_spill]] %s3651_s23  ;;  %s3653_s24 = smov (!%p37_p0, %s39_s24), %s3021_s19 }
  0x17   : > { %p3154_p3 = por %p421_p2, %p420_p1  ;;  %p426_p4 = scmp.ne.s32.totalorder %s3001_s30, %s2997_s29 }
  0x18   : > { %p41_p5 = scmp.ge.s32.totalorder %s3653_s24, 2  ;;  %p427_p6 = scmp.eq.s32.totalorder %s2458_s22, 3 }
  0x19   : > { %s3613_s25 = scalar_select %p3154_p3, 1, 0 }
  0x1a   : > { %p2461_p7 = scmp.ge.s32.totalorder %s3025_s20, 1  ;;  %p542_p8 = scmp.lt.s32.totalorder %s3025_s20, 5 }
  0x1b   : > { %3614 = sst [smem:[#allocation14_spill]] %s3613_s25  ;;  %s3655_s24 = smov (%p41_p5, %s3653_s24), 0 }
  0x1c   : > { %3615 = sst [smem:[#allocation15_spill]] %s3655_s24  ;;  %p3164_p9 = por %p427_p6, %p426_p4 }
  0x1d   : > { %p543_p10 = pnand %p2461_p7, %p542_p8  ;;  %s407_s27 = ssub.s32 %s3021_s19, %s3655_s24 }
  0x1e   : > { %s3616_s26 = scalar_select %p3164_p9, 1, 0 }
  0x1f   : > { %s410_s28 = sadd.s32 1, %s3005_s15  ;;  %p408_p11 = scmp.eq.s32.totalorder %s407_s27, 0 }
  0x20   : > { %3617 = sst [smem:[#allocation16_spill]] %s3616_s26  ;;  %546 = sbr.rel (%p543_p10) target bundleno = 2371 (0x943), region = 76 }
  0x21   : > { %s3172_s21 = scalar_select %p408_p11, %s3005_s15, %s410_s28  }
  0x23   : > { %3618 = sst [smem:[#allocation17_spill]] %s3172_s21 }
  0x27   : > { %s3584_s22 = sand.u32 1, %s3001_s30   ;;  %p638_p12 = scmp.lt.s32.totalorder %s3013_s17, 1 }
  0x28   : > { %s2462_s23 = sshll.u32 %s3584_s22, 3  ;;  %p642_p13 = scmp.lt.s32.totalorder %s3009_s16, 1 }
  0x29   : > { %s639_s18 = scalar_select %p638_p12, %s3013_s17, 1 }
  0x2a   : > { %s3181_s26 = scalar_select %p642_p13, %s3009_s16, 1 }
  0x2b   : > { %s2463_s27 = sshll.u32 %s639_s18, 3  ;;  %s3619_s0 = sld [smem:[#allocation19_spill]] }
  0x2c   : > { %s2544_s25 = sshll.u32 %s3181_s26, 6  ;;  %s3620_s3 = sld [smem:[#allocation20_spill]] }
  0x2d   : > { %s3621_s4 = sld [smem:[#allocation21_spill]]  ;;  %s3622_s5 = sld [smem:[#allocation22_spill]] }
  0x2e   : > { %s2547_s22 = sshll.u32 %s3181_s26, 4  ;;  %s3623_s6 = sld [smem:[#allocation23_spill]] }
  0x2f   : > { %s692_s17 = scalar_lea.vmem %s3578_s13, %s3181_s26  ;;  %s3626_s12 = sld [smem:[#allocation25_spill]] }
  0x30   : > { %s3627_s18 = sld [smem:[#allocation8_spill]] }
  0x31   : > { %s641_s19 = scalar_lea.vmem %s3619_s0, %s2463_s27  ;;  %s676_s27 = scalar_lea.vmem %s3574_s9, %s3181_s26 }
  0x32   : > { %s3198_s16 = scalar_lea.vmem %s3620_s3, %s2544_s25 }
  0x33   : > { %s3203_s24 = scalar_lea.vmem %s3621_s4, %s2544_s25  ;;  %s3208_s21 = scalar_lea.vmem %s3622_s5, %s2544_s25 }
  0x34   : > { %s3214_s20 = scalar_lea.vmem %s3623_s6, %s2547_s22  ;;  %s3231_s5 = scalar_lea.vmem %s3575_s10, %s2547_s22 }
  0x35   : > { %3624 = sst [smem:[#allocation18_spill]] %s3214_s20  ;;  %s684_s6 = scalar_lea.vmem %s3576_s11, %s3181_s26 }
  0x36   : > { %s2549_s20 = sshll.u32 %s3181_s26, 5  ;;  %s3247_s4 = scalar_lea.vmem [#allocation2], %s2462_s23 }
  0x37   : > { %s3245_s8 = scalar_lea.vmem %s3626_s12, %s2549_s20  ;;  %p2476_p0 = scmp.ne.s32.totalorder %s3627_s18, 0 }
  0x38   : > { %v698_v0 = vld [vmem:[%s641_s19] sm:$0xff] (!%p2476_p0)  ;;  %vm699_vm0 = vcmask (!%p2476_p0), 261120  }
  0x39   : > { %697 = sbr.rel (%p2476_p0) target bundleno = 64 (0x40), region = 80  ;;  %700 = vst.msk [vmem:[%s3247_s4] sm:$0xff] (!%p2476_p0), %vm699_vm0, %v698_v0 }
  0x40 PF: > { %v3252_v1 = vld [vmem:[%s3247_s4] sm:$0xff]  ;;  %vm704_vm1 = vcmask 261120   ;;  %v2880_v9 = vld [vmem:[%s3198_s16 + $0x10] sm:$0xff]   ;;  %v3027_v10 = vmov 0.0   ;;  %v2882_v12 = vld [vmem:[%s3198_s16 + $0x18] sm:$0xff]   ;;  %vm3028_vm2 = vmmov 0   ;;  %s3628_s22 = scalar_lea.vmem %s3566_s1, %s3181_s26  ;;  %s3629_s25 = scalar_lea.vmem %s3567_s2, %s3181_s26 }
  0x41   : > { %v705_v2 = vsel %vm704_vm1, %v3252_v1, 0.0  ;;  %v2879_v8 = vld [vmem:[%s3198_s16] sm:$0xff]   ;;  %2618 = vmatprep.subr.bf16.mxu0 %v3027_v10  ;;  %2626 = vmatprep.subr.bf16.mxu1 %v3027_v10  ;;  %v2881_v11 = vld [vmem:[%s3198_s16 + $0x8] sm:$0xff]   ;;  %v2884_v23 = vld [vmem:[%s3198_s16 + $0x30] sm:$0xff]   ;;  %vm1417_vm3 = vcmask 64512   ;;  %vm1661_vm4 = vcmask 1043456   ;;  %s3631_s28 = scalar_lea.vmem %s3572_s7, %s3181_s26 }
  0x42   : > { %706 = vadd.xlane.f32.xlu0 %v705_v2  ;;  %2619 = vmatpush3.bf16.msra.mxu0 %v2879_v8  ;;  %v2477_v17 = vld [vmem:[%s3628_s22] ss:$0 sm:$0xff]  ;;  %v2885_v25 = vld [vmem:[%s3198_s16 + $0x28] sm:$0xff]   ;;  %v2886_v26 = vld [vmem:[%s3198_s16 + $0x38] sm:$0xff]   ;;  %s3632_s14 = sld [smem:[#allocation24_spill]]  ;;  %s3634_s18 = sld [smem:[#allocation9_spill]] }
  0x43   : > { %2627 = vmatpush3.bf16.msra.mxu1 %v2880_v9  ;;  %2620 = vmatprep.subr.bf16.mxu0 %v3027_v10  ;;  %v2478_v19 = vld [vmem:[%s3629_s25] ss:$0 sm:$0xff]  ;;  %v2888_v28 = vld [vmem:[%s3203_s24 + $0x10] sm:$0xff]   ;;  %v2889_v29 = vld [vmem:[%s3203_s24 + $0x8] sm:$0xff]   ;;  %vm2192_vm5 = vcmask 523264   ;;  %s2252_s20 = sshll.u32 %s3247_s4, 4  ;;  %s3510_s20 = int_to_ptr.vmem [resolvable:$true] %s2252_s20 }
  0x44   : > { %2628 = vmatprep.subr.bf16.mxu1 %v3027_v10  ;;  %2622 = vmatprep.mubr.msk.bf16.mxu0 %vm3028_vm2, %v3027_v10  ;;  %v2883_v22 = vld [vmem:[%s3198_s16 + $0x20] sm:$0xff]   ;;  %v2890_v30 = vld [vmem:[%s3203_s24 + $0x18] sm:$0xff]   ;;  %v2892_v32 = vld [vmem:[%s3203_s24 + $0x30] sm:$0xff]   ;;  %s3630_s16 = sld [smem:[#allocation18_spill]]  ;;  %s3029_s15 = smov [#allocation2]  }
  0x45   : > { %2630 = vmatprep.mubr.msk.bf16.mxu1 %vm3028_vm2, %v3027_v10  ;;  %v2887_v27 = vld [vmem:[%s3203_s24] sm:$0xff]   ;;  %v2893_v33 = vld [vmem:[%s3203_s24 + $0x28] sm:$0xff]   ;;  %v2894_v34 = vld [vmem:[%s3203_s24 + $0x38] sm:$0xff]   ;;  %s2935_s29 = sshll.u32 %s3029_s15, 4  ;;  %s2936_s29 = int_to_ptr.vmem [resolvable:$false] %s2935_s29 }
  0x46   : > { %2621 = vmatpush3.bf16.msra.mxu0 %v2881_v11  ;;  %v2891_v31 = vld [vmem:[%s3203_s24 + $0x20] sm:$0xff]   ;;  %v2896_v36 = vld [vmem:[%s3208_s21 + $0x10] sm:$0xff]   ;;  %v2897_v37 = vld [vmem:[%s3208_s21 + $0x8] sm:$0xff]   ;;  %p2938_p5 = scmp.lt.s32.totalorder %s3510_s20, %s2936_s29 }
  0x47   : > { %2629 = vmatpush3.bf16.msra.mxu1 %v2882_v12  ;;  %2634 = vmatprep.subr.bf16.mxu0 %v3027_v10  ;;  %v2895_v35 = vld [vmem:[%s3208_s21] sm:$0xff]   ;;  %v2898_v38 = vld [vmem:[%s3208_s21 + $0x18] sm:$0xff]   ;;  %v2900_v40 = vld [vmem:[%s3208_s21 + $0x30] sm:$0xff]  }
  0x48   : > { %2642 = vmatprep.subr.bf16.mxu1 %v3027_v10  ;;  %v2899_v39 = vld [vmem:[%s3208_s21 + $0x20] sm:$0xff]   ;;  %v2901_v41 = vld [vmem:[%s3208_s21 + $0x28] sm:$0xff]   ;;  %v2902_v42 = vld [vmem:[%s3208_s21 + $0x38] sm:$0xff]   ;;  %s3633_s30 = scalar_lea.vmem %s3632_s14, %s3181_s26  ;;  %s2541_s22 = sshll.u32 %s3634_s18, 7 }
  0x49   : > { %s2937_s14 = scalar_lea.vmem %s2936_s29, 256 }
  0xcf   : > { %v707_v3 = vpop.xlane.xlu0 %706 }
  0xd0   : > { %v709_v4 = vmul.f32 0.03125, %v707_v3 }
  0xd2   : > { %v710_v5 = vsub.f32 %v3252_v1, %v709_v4 }
  0xd4   : > { %v711_v6 = vmul.f32 %v710_v5, %v710_v5 }
  0xd6   : > { %v712_v7 = vsel %vm704_vm1, %v711_v6, 0.0 }
  0xd7   : > { %713 = vadd.xlane.f32.xlu0 %v712_v7 }
 0x164   : > { %v714_v13 = vpop.xlane.xlu0 %713 }
 0x165   : > { %v715_v14 = vmul.f32 0.03125, %v714_v13 }
 0x167   : > { %v716_v15 = vadd.f32 1e-05, %v715_v14 }
 0x169   : > { %2909 = vrsqrt.f32 %v716_v15 }
 0x173   : > { %v2910_v16 = vpop.eup %2909 }
 0x174   : > { %v718_v18 = vmul.f32 %v2910_v16, %v710_v5 }
 0x176   : > { %v725_v20 = vmul.f32 %v2477_v17, %v718_v18 }
 0x178   : > { %v732_v21 = vadd.f32 %v2478_v19, %v725_v20 }
 0x17a   : > { %v3284_v24 = vpack.c.bf16 %v732_v21, %v732_v21 }
 0x17c   : > { %2623 = vmatmul.mubr.msk.bf16.vlgmr.msra.gmra.mrb[0].mxu0 %vm704_vm1, %v3284_v24  ;;  %2631 = vmatmul.mubr.msk.bf16.vlgmr.msra.gmra.mrb[0].mxu1 %vm704_vm1, %v3284_v24 }
 0x17d   : > { %2635 = vmatpush3.bf16.msra.mxu0 %v2883_v22  ;;  %2643 = vmatpush3.bf16.msra.mxu1 %v2884_v23 }
 0x17e   : > { %2636 = vmatprep.subr.bf16.mxu0 %v3027_v10  ;;  %2644 = vmatprep.subr.bf16.mxu1 %v3027_v10 }
 0x17f   : > { %2638 = vmatprep.mubr.msk.bf16.mxu0 %vm3028_vm2, %v3027_v10  ;;  %2646 = vmatprep.mubr.msk.bf16.mxu1 %vm3028_vm2, %v3027_v10 }
 0x181   : > { %2637 = vmatpush3.bf16.msra.mxu0 %v2885_v25  ;;  %2645 = vmatpush3.bf16.msra.mxu1 %v2886_v26 }
 0x182   : > { %2650 = vmatprep.subr.bf16.mxu0 %v3027_v10  ;;  %2658 = vmatprep.subr.bf16.mxu1 %v3027_v10 }
 0x184   : > { %2639 = vmatmul.mubr.msk.bf16.vlgmr.msra.gmra.mrb[4].mxu0 %vm704_vm1, %v3284_v24  ;;  %2647 = vmatmul.mubr.msk.bf16.vlgmr.msra.gmra.mrb[4].mxu1 %vm704_vm1, %v3284_v24 }
 0x185   : > { %2651 = vmatpush3.bf16.msra.mxu0 %v2887_v27  ;;  %2659 = vmatpush3.bf16.msra.mxu1 %v2888_v28 }
 0x186   : > { %2652 = vmatprep.subr.bf16.mxu0 %v3027_v10  ;;  %2660 = vmatprep.subr.bf16.mxu1 %v3027_v10 }
 0x187   : > { %2654 = vmatprep.mubr.msk.bf16.mxu0 %vm3028_vm2, %v3027_v10  ;;  %2662 = vmatprep.mubr.msk.bf16.mxu1 %vm3028_vm2, %v3027_v10 }
 0x189   : > { %2653 = vmatpush3.bf16.msra.mxu0 %v2889_v29  ;;  %2661 = vmatpush3.bf16.msra.mxu1 %v2890_v30 }
 0x18a   : > { %2666 = vmatprep.subr.bf16.mxu0 %v3027_v10  ;;  %2674 = vmatprep.subr.bf16.mxu1 %v3027_v10 }
 0x18c   : > { %2655 = vmatmul.mubr.msk.bf16.vlgmr.msra.gmra.mrb[8].mxu0 %vm704_vm1, %v3284_v24  ;;  %2663 = vmatmul.mubr.msk.bf16.vlgmr.msra.gmra.mrb[8].mxu1 %vm704_vm1, %v3284_v24 }
 0x18d   : > { %2667 = vmatpush3.bf16.msra.mxu0 %v2891_v31  ;;  %2675 = vmatpush3.bf16.msra.mxu1 %v2892_v32 }
 0x18e   : > { %2668 = vmatprep.subr.bf16.mxu0 %v3027_v10  ;;  %2676 = vmatprep.subr.bf16.mxu1 %v3027_v10 }
 0x18f   : > { %2670 = vmatprep.mubr.msk.bf16.mxu0 %vm3028_vm2, %v3027_v10  ;;  %2678 = vmatprep.mubr.msk.bf16.mxu1 %vm3028_vm2, %v3027_v10 }
 0x191   : > { %2669 = vmatpush3.bf16.msra.mxu0 %v2893_v33  ;;  %2677 = vmatpush3.bf16.msra.mxu1 %v2894_v34 }
 0x192   : > { %2682 = vmatprep.subr.bf16.mxu0 %v3027_v10  ;;  %2690 = vmatprep.subr.bf16.mxu1 %v3027_v10 }
 0x194   : > { %2671 = vmatmul.mubr.msk.bf16.vlgmr.msra.gmra.mrb[12].mxu0 %vm704_vm1, %v3284_v24  ;;  %2679 = vmatmul.mubr.msk.bf16.vlgmr.msra.gmra.mrb[12].mxu1 %vm704_vm1, %v3284_v24 }
 0x195   : > { %2683 = vmatpush3.bf16.msra.mxu0 %v2895_v35  ;;  %2691 = vmatpush3.bf16.msra.mxu1 %v2896_v36 }
 0x196   : > { %2684 = vmatprep.subr.bf16.mxu0 %v3027_v10  ;;  %2692 = vmatprep.subr.bf16.mxu1 %v3027_v10 }
 0x197   : > { %2686 = vmatprep.mubr.msk.bf16.mxu0 %vm3028_vm2, %v3027_v10  ;;  %2694 = vmatprep.mubr.msk.bf16.mxu1 %vm3028_vm2, %v3027_v10 }
 0x199   : > { %2685 = vmatpush3.bf16.msra.mxu0 %v2897_v37  ;;  %2693 = vmatpush3.bf16.msra.mxu1 %v2898_v38 }
 0x19a   : > { %2698 = vmatprep.subr.bf16.mxu0 %v3027_v10  ;;  %2706 = vmatprep.subr.bf16.mxu1 %v3027_v10 }
 0x19c   : > { %2687 = vmatmul.mubr.msk.bf16.vlgmr.msra.gmra.mrb[16].mxu0 %vm704_vm1, %v3284_v24  ;;  %2695 = vmatmul.mubr.msk.bf16.vlgmr.msra.gmra.mrb[16].mxu1 %vm704_vm1, %v3284_v24 }
 0x19d   : > { %2699 = vmatpush3.bf16.msra.mxu0 %v2899_v39  ;;  %2707 = vmatpush3.bf16.msra.mxu1 %v2900_v40 }
 0x19e   : > { %2700 = vmatprep.subr.bf16.mxu0 %v3027_v10  ;;  %2708 = vmatprep.subr.bf16.mxu1 %v3027_v10 }
 0x19f   : > { %2702 = vmatprep.mubr.msk.bf16.mxu0 %vm3028_vm2, %v3027_v10  ;;  %2710 = vmatprep.mubr.msk.bf16.mxu1 %vm3028_vm2, %v3027_v10 }
 0x1a1   : > { %2701 = vmatpush3.bf16.msra.mxu0 %v2901_v41  ;;  %2709 = vmatpush3.bf16.msra.mxu1 %v2902_v42 }
 0x1a2   : > { %2714 = vmatprep.subr.bf16.mxu0 %v3027_v10  ;;  %2720 = vmatprep.subr.bf16.mxu1 %v3027_v10 }
 0x1a4   : > { %2703 = vmatmul.mubr.msk.bf16.vlgmr.msra.gmra.mrb[20].mxu0 %vm704_vm1, %v3284_v24  ;;  %2711 = vmatmul.mubr.msk.bf16.vlgmr.msra.gmra.mrb[20].mxu1 %vm704_vm1, %v3284_v24 }
 0x1a5   : > { %2716 = vmatprep.mubr.msk.bf16.mxu0 %vm3028_vm2, %v3027_v10  ;;  %2722 = vmatprep.mubr.msk.bf16.mxu1 %vm3028_vm2, %v3027_v10 }
 0x24f   : > { %v799_v43 = vpop.f32.mrb[0].mxu0  ;;  %v851_v44 = vpop.f32.mrb[0].mxu1 }
 0x250   : > { %v2624_v45 = vpop.f32.mrb[1].mxu0  ;;  %v2632_v46 = vpop.f32.mrb[1].mxu1  ;;  %v1409_v11 = vpack.c.bf16 %v799_v43, %v799_v43  ;;  %v1410_v12 = vpack.c.bf16 %v851_v44, %v851_v44 }
 0x251   : > { %v802_v47 = vpop.f32.mrb[2].mxu0  ;;  %v854_v48 = vpop.f32.mrb[2].mxu1 }
 0x252   : > { %v2625_v49 = vpop.f32.mrb[3].mxu0  ;;  %v2633_v50 = vpop.f32.mrb[3].mxu1 }
 0x257   : > { %v3372_v51 = vpop.f32.mrb[4].mxu0  ;;  %v3374_v52 = vpop.f32.mrb[4].mxu1 }
 0x258   : > { %v2640_v53 = vpop.f32.mrb[5].mxu0  ;;  %v2648_v54 = vpop.f32.mrb[5].mxu1  ;;  %v1411_v25 = vpack.c.bf16 %v3372_v51, %v3372_v51  ;;  %v1412_v26 = vpack.c.bf16 %v3374_v52, %v3374_v52 }
 0x259   : > { %v906_v55 = vpop.f32.mrb[6].mxu0  ;;  %v958_v56 = vpop.f32.mrb[6].mxu1 }
 0x25a   : > { %v2641_v57 = vpop.f32.mrb[7].mxu0  ;;  %v2649_v58 = vpop.f32.mrb[7].mxu1 }
 0x25f   : > { %v1023_v59 = vpop.f32.mrb[8].mxu0  ;;  %v1075_v60 = vpop.f32.mrb[8].mxu1 }
 0x260   : > { %v1413_v61 = vpack.c.bf16 %v1023_v59, %v1023_v59  ;;  %v1414_v62 = vpack.c.bf16 %v1075_v60, %v1075_v60  ;;  %v2656_v63 = vpop.f32.mrb[9].mxu0  ;;  %v2664_v0 = vpop.f32.mrb[9].mxu1 }
 0x261   : > { %v1026_v2 = vpop.f32.mrb[10].mxu0  ;;  %v1078_v3 = vpop.f32.mrb[10].mxu1 }
 0x262   : > { %v1422_v4 = vsel %vm1417_vm3, %v1413_v61, 0  ;;  %v1468_v5 = vsel %vm1417_vm3, %v1414_v62, 0  ;;  %v2657_v6 = vpop.f32.mrb[11].mxu0  ;;  %v2665_v7 = vpop.f32.mrb[11].mxu1 }
 0x263   : > { %2715 = vmatpush3.bf16.xpose.msra.mxu0 %v1422_v4  ;;  %2721 = vmatpush3.bf16.xpose.msra.mxu1 %v1468_v5 }
 0x264   : > { %2726 = vmatprep.subr.bf16.mxu0 %v3027_v10  ;;  %2732 = vmatprep.subr.bf16.mxu1 %v3027_v10 }
 0x267   : > { %v1127_v8 = vpop.f32.mrb[12].mxu0  ;;  %v1179_v9 = vpop.f32.mrb[12].mxu1 }
 0x268   : > { %v1415_v13 = vpack.c.bf16 %v1127_v8, %v1127_v8  ;;  %v1416_v14 = vpack.c.bf16 %v1179_v9, %v1179_v9  ;;  %v2672_v15 = vpop.f32.mrb[13].mxu0  ;;  %v2680_v16 = vpop.f32.mrb[13].mxu1 }
 0x269   : > { %v1130_v17 = vpop.f32.mrb[14].mxu0  ;;  %v1182_v18 = vpop.f32.mrb[14].mxu1 }
 0x26a   : > { %v1514_v19 = vsel %vm1417_vm3, %v1415_v13, 0  ;;  %v1560_v20 = vsel %vm1417_vm3, %v1416_v14, 0  ;;  %v2673_v21 = vpop.f32.mrb[15].mxu0  ;;  %v2681_v22 = vpop.f32.mrb[15].mxu1  ;;  %2717 = vmatmul.mubr.msk.bf16.vlgmr.msra.gmra.mrb[24].mxu0 %vm1417_vm3, %v1409_v11  ;;  %2723 = vmatmul.mubr.msk.bf16.vlgmr.msra.gmra.mrb[24].mxu1 %vm1417_vm3, %v1410_v12 }
 0x26b   : > { %2727 = vmatpush3.bf16.xpose.msra.mxu0 %v1514_v19  ;;  %2733 = vmatpush3.bf16.xpose.msra.mxu1 %v1560_v20 }
 0x26c   : > { %2728 = vmatprep.mubr.msk.bf16.mxu0 %vm3028_vm2, %v3027_v10  ;;  %2734 = vmatprep.mubr.msk.bf16.mxu1 %vm3028_vm2, %v3027_v10 }
 0x26d   : > { %2738 = vmatprep.subr.bf16.mxu0 %v3027_v10  ;;  %2744 = vmatprep.subr.bf16.mxu1 %v3027_v10 }
 0x26f   : > { %v1247_v23 = vpop.f32.mrb[16].mxu0  ;;  %v1299_v24 = vpop.f32.mrb[16].mxu1 }
 0x270   : > { %v1654_v27 = vpack.c.bf16 %v1247_v23, %v1247_v23  ;;  %v1655_v28 = vpack.c.bf16 %v1299_v24, %v1299_v24  ;;  %v2688_v29 = vpop.f32.mrb[17].mxu0  ;;  %v2696_v30 = vpop.f32.mrb[17].mxu1 }
 0x271   : > { %v1250_v31 = vpop.f32.mrb[18].mxu0  ;;  %v1302_v32 = vpop.f32.mrb[18].mxu1 }
 0x272   : > { %v1663_v33 = vsel %vm1661_vm4, %v1654_v27, 0  ;;  %v1709_v34 = vsel %vm1661_vm4, %v1655_v28, 0  ;;  %v2689_v35 = vpop.f32.mrb[19].mxu0  ;;  %v2697_v36 = vpop.f32.mrb[19].mxu1  ;;  %2729 = vmatmul.mubr.msk.bf16.vlgmr.msra.gmra.mrb[28].mxu0 %vm1417_vm3, %v1411_v25  ;;  %2735 = vmatmul.mubr.msk.bf16.vlgmr.msra.gmra.mrb[28].mxu1 %vm1417_vm3, %v1412_v26 }
 0x273   : > { %2739 = vmatpush3.bf16.msra.mxu0 %v1663_v33  ;;  %2745 = vmatpush3.bf16.msra.mxu1 %v1709_v34 }
 0x274   : > { %2740 = vmatprep.mubr.msk.bf16.mxu0 %vm3028_vm2, %v3027_v10  ;;  %2750 = vmatprep.subr.bf16.mxu0 %v3027_v10 }
 0x275   : > { %2746 = vmatprep.mubr.msk.bf16.mxu1 %vm3028_vm2, %v3027_v10  ;;  %2756 = vmatprep.subr.bf16.mxu1 %v3027_v10 }
 0x277   : > { %v3404_v37 = vpop.f32.mrb[20].mxu0  ;;  %v3406_v38 = vpop.f32.mrb[20].mxu1 }
 0x278   : > { %v2704_v39 = vpop.f32.mrb[21].mxu0  ;;  %v2712_v40 = vpop.f32.mrb[21].mxu1  ;;  %v1656_v32 = vpack.c.bf16 %v3404_v37, %v3404_v37 }
 0x279   : > { %v1354_v41 = vpop.f32.mrb[22].mxu0  ;;  %v1406_v42 = vpop.f32.mrb[22].mxu1  ;;  %v1657_v39 = vpack.c.bf16 %v3406_v38, %v3406_v38 }
 0x27a   : > { %v2705_v43 = vpop.f32.mrb[23].mxu0  ;;  %v2713_v44 = vpop.f32.mrb[23].mxu1  ;;  %v1755_v36 = vsel %vm1661_vm4, %v1656_v32, 0 }
 0x27b   : > { %v1801_v43 = vsel %vm1661_vm4, %v1657_v39, 0  ;;  %v1847_v44 = vld [vmem:[%s3630_s16] sm:$0xf] }
 0x33d   : > { %v1458_v45 = vpop.f32.mrb[24].mxu0  ;;  %v1504_v46 = vpop.f32.mrb[24].mxu1 }
 0x33e   : > { %v1602_v47 = vmul.f32 0.17677669, %v1458_v45  ;;  %v2718_v48 = vpop.f32.mrb[25].mxu0  ;;  %v2724_v49 = vpop.f32.mrb[25].mxu1  ;;  %v1603_v52 = vmul.f32 0.17677669, %v1504_v46 }
 0x33f   : > { %v1461_v50 = vpop.f32.mrb[26].mxu0  ;;  %v1507_v51 = vpop.f32.mrb[26].mxu1  ;;  %v1848_v49 = vld [vmem:[%s3630_s16 + $0x4] sm:$0xf] }
 0x340   : > { %v2719_v53 = vpop.f32.mrb[27].mxu0  ;;  %v2725_v54 = vpop.f32.mrb[27].mxu1  ;;  %v1606_v55 = vsel %vm1417_vm3, %v1602_v47, -inf  ;;  %v1609_v56 = vsel %vm1417_vm3, %v1603_v52, -inf  ;;  %v1901_v50 = vsel %vm1661_vm4, %v1848_v49, 0 }
 0x341   : > { %1607 = vmax.xlane.f32.xlu1 %v1606_v55  ;;  %v1849_v51 = vld [vmem:[%s3630_s16 + $0x8] sm:$0xf] }
 0x342   : > { %v1947_v55 = vsel %vm1661_vm4, %v1849_v51, 0 }
 0x345   : > { %v1596_v57 = vpop.f32.mrb[28].mxu1  ;;  %1610 = vmax.xlane.f32.xlu1 %v1609_v56  ;;  %v1550_v58 = vpop.f32.mrb[28].mxu0 }
 0x346   : > { %v1605_v59 = vmul.f32 0.17677669, %v1596_v57  ;;  %v1604_v60 = vmul.f32 0.17677669, %v1550_v58  ;;  %v2730_v61 = vpop.f32.mrb[29].mxu0  ;;  %v2736_v62 = vpop.f32.mrb[29].mxu1 }
 0x347   : > { %v1553_v63 = vpop.f32.mrb[30].mxu0  ;;  %v1599_v0 = vpop.f32.mrb[30].mxu1  ;;  %v1850_v57 = vld [vmem:[%s3630_s16 + $0xc] sm:$0xf]  ;;  %s3637_s16 = sld [smem:[#allocation26_spill]] }
 0x348   : > { %v2731_v2 = vpop.f32.mrb[31].mxu0  ;;  %v2737_v3 = vpop.f32.mrb[31].mxu1  ;;  %v1615_v4 = vsel %vm1417_vm3, %v1605_v59, -inf  ;;  %v1612_v5 = vsel %vm1417_vm3, %v1604_v60, -inf  ;;  %v1993_v62 = vsel %vm1661_vm4, %v1850_v57, 0  ;;  %v2906_v57 = vld [vmem:[%s3245_s8 + $0x8] sm:$0xff]  }
 0x349   : > { %1616 = vmax.xlane.f32.xlu1 %v1615_v4  ;;  %1613 = vmax.xlane.f32.xlu0 %v1612_v5 }
 0x34d   : > { %s3638_s24 = smov %s3637_s16  ;;  %s3508_s21 = scalar_lea.hbm %s3637_s16, %s2541_s22 }
 0x3ce   : > { %v1608_v6 = vpop.xlane.xlu1 %1607 }
 0x3cf   : > { %v1618_v7 = vsub.f32 %v1602_v47, %v1608_v6  ;;  %v1855_v47 = vsel %vm1661_vm4, %v1847_v44, 0 }
 0x3d1   : > { %v1622_v8 = vmul.f32 1.442695, %v1618_v7 }
 0x3d2   : > { %v1611_v9 = vpop.xlane.xlu1 %1610 }
 0x3d3   : > { %2911 = vpow2.f32 %v1622_v8  ;;  %v1619_v11 = vsub.f32 %v1603_v52, %v1611_v9 }
 0x3d5   : > { %v1624_v12 = vmul.f32 1.442695, %v1619_v11 }
 0x3d6   : > { %v1617_v13 = vpop.xlane.xlu1 %1616  ;;  %v1614_v14 = vpop.xlane.xlu0 %1613 }
 0x3d7   : > { %2913 = vpow2.f32 %v1624_v12  ;;  %v1621_v15 = vsub.f32 %v1605_v59, %v1617_v13  ;;  %v1620_v16 = vsub.f32 %v1604_v60, %v1614_v14 }
 0x3d9   : > { %v1628_v17 = vmul.f32 1.442695, %v1621_v15  ;;  %v1626_v18 = vmul.f32 1.442695, %v1620_v16 }
 0x3db   : > { %2915 = vpow2.f32 %v1628_v17 }
 0x3dc   : > { %2917 = vpow2.f32 %v1626_v18 }
 0x3dd   : > { %v2912_v19 = vpop.eup %2911 }
 0x3de   : > { %v1630_v20 = vsel %vm1417_vm3, %v2912_v19, 0.0 }
 0x3df   : > { %1631 = vadd.xlane.f32.xlu0 %v1630_v20 }
 0x3e1   : > { %v2914_v21 = vpop.eup %2913 }
 0x3e2   : > { %v1633_v22 = vsel %vm1417_vm3, %v2914_v21, 0.0 }
 0x3e3   : > { %1634 = vadd.xlane.f32.xlu1 %v1633_v22 }
 0x3e5   : > { %v2916_v23 = vpop.eup %2915 }
 0x3e6   : > { %v2918_v24 = vpop.eup %2917  ;;  %v1639_v25 = vsel %vm1417_vm3, %v2916_v23, 0.0 }
 0x3e7   : > { %1640 = vadd.xlane.f32.xlu1 %v1639_v25  ;;  %v1636_v26 = vsel %vm1417_vm3, %v2918_v24, 0.0 }
 0x3e8   : > { %1637 = vadd.xlane.f32.xlu0 %v1636_v26 }
 0x46c   : > { %v1632_v27 = vpop.xlane.xlu0 %1631 }
 0x46d   : > { %2919 = vrcp.f32 %v1632_v27 }
 0x470   : > { %v1635_v28 = vpop.xlane.xlu1 %1634 }
 0x471   : > { %2921 = vrcp.f32 %v1635_v28 }
 0x474   : > { %v1641_v29 = vpop.xlane.xlu1 %1640 }
 0x475   : > { %2923 = vrcp.f32 %v1641_v29  ;;  %v1638_v30 = vpop.xlane.xlu0 %1637 }
 0x476   : > { %2925 = vrcp.f32 %v1638_v30 }
 0x477   : > { %v2920_v31 = vpop.eup %2919 }
 0x478   : > { %v1646_v33 = vmul.f32 %v2920_v31, %v2912_v19 }
 0x47a   : > { %v1650_v34 = vpack.c.bf16 %v1646_v33, %v1646_v33 }
 0x47b   : > { %v2922_v35 = vpop.eup %2921 }
 0x47c   : > { %v1647_v40 = vmul.f32 %v2922_v35, %v2914_v21  ;;  %2741 = vmatmul.mubr.msk.bf16.vlgmr.msra.gmra.mrb[32].mxu0 %vm1417_vm3, %v1650_v34 }
 0x47d   : > { %2751 = vmatpush3.bf16.msra.mxu0 %v1755_v36  ;;  %2752 = vmatprep.mubr.msk.bf16.mxu0 %vm3028_vm2, %v3027_v10  ;;  %v2527_v36 = vld [vmem:[%s3631_s28] ss:$0 sm:$0xff]  ;;  %s2931_s28 = scalar_lea.vmem %s3510_s20, 128 }
 0x47e   : > { %v1651_v41 = vpack.c.bf16 %v1647_v40, %v1647_v40  ;;  %2762 = vmatprep.subr.bf16.mxu0 %v3027_v10  ;;  %p2932_p1 = scmp.ne.s32.totalorder %s3510_s20, %s2931_s28  ;;  %p2939_p6 = scmp.lt.s32.totalorder %s2937_s14, %s2931_s28 }
 0x47f   : > { %v2924_v37 = vpop.eup %2923 }
 0x480   : > { %v2926_v42 = vpop.eup %2925  ;;  %2747 = vmatmul.mubr.msk.bf16.vlgmr.msra.gmra.mrb[32].mxu1 %vm1417_vm3, %v1651_v41  ;;  %v1649_v38 = vmul.f32 %v2924_v37, %v2916_v23  ;;  %p2933_p2 = pnand %p2932_p1, %p3154_p3  ;;  %p2940_p7 = por %p2939_p6, %p2938_p5 }
 0x481   : > { %v1648_v45 = vmul.f32 %v2926_v42, %v2918_v24  ;;  %2757 = vmatpush3.bf16.msra.mxu1 %v1801_v43  ;;  %2758 = vmatprep.mubr.msk.bf16.mxu1 %vm3028_vm2, %v3027_v10 }
 0x482   : > { %2768 = vmatprep.subr.bf16.mxu1 %v3027_v10  ;;  %v1653_v48 = vpack.c.bf16 %v1649_v38, %v1649_v38  ;;  %v2903_v38 = vld [vmem:[%s3231_s5] sm:$0xff]   ;;  %p2934_p4 = pneg %p2933_p2 }
 0x483   : > { %v1652_v46 = vpack.c.bf16 %v1648_v45, %v1648_v45 }
 0x484   : > { %p2941_p8 = pnand %p2940_p7, %p2934_p4 }
 0x485   : > { %2753 = vmatmul.mubr.msk.bf16.vlgmr.msra.gmra.mrb[36].mxu0 %vm1417_vm3, %v1652_v46  ;;  %v2904_v46 = vld [vmem:[%s3231_s5 + $0x8] sm:$0xff]  }
 0x486   : > { %2763 = vmatpush3.bf16.msra.mxu0 %v1855_v47  ;;  %2764 = vmatprep.mubr.msk.bf16.mxu0 %vm3028_vm2, %v3027_v10 }
 0x487   : > { %2774 = vmatprep.subr.bf16.mxu0 %v3027_v10 }
 0x488   : > { %2759 = vmatmul.mubr.msk.bf16.vlgmr.msra.gmra.mrb[36].mxu1 %vm1417_vm3, %v1653_v48 }
 0x489   : > { %2770 = vmatprep.mubr.msk.bf16.mxu1 %vm3028_vm2, %v3027_v10  ;;  %2769 = vmatpush3.bf16.msra.mxu1 %v1901_v50  ;;  %v2528_v50 = vld [vmem:[%s3633_s30] ss:$0 sm:$0xff] }
 0x48a   : > { %2780 = vmatprep.subr.bf16.mxu1 %v3027_v10 }
 0x54f   : > { %v1699_v52 = vpop.f32.mrb[32].mxu0 }
 0x550   : > { %v1843_v53 = vpack.c.bf16 %v1699_v52, %v1699_v52  ;;  %v2742_v54 = vpop.f32.mrb[33].mxu0  ;;  %v2529_v52 = vld [vmem:[%s676_s27] ss:$0 sm:$0xff] }
 0x551   : > { %v1702_v56 = vpop.f32.mrb[34].mxu0 }
 0x552   : > { %v2743_v58 = vpop.f32.mrb[35].mxu0  ;;  %2765 = vmatmul.mubr.msk.bf16.vlgmr.msra.gmra.mrb[40].mxu0 %vm1417_vm3, %v1843_v53  ;;  %v2905_v56 = vld [vmem:[%s3245_s8] sm:$0xff]  }
 0x553   : > { %v1745_v59 = vpop.f32.mrb[32].mxu1  ;;  %2775 = vmatpush3.bf16.msra.mxu0 %v1947_v55  ;;  %2776 = vmatprep.mubr.msk.bf16.mxu0 %vm3028_vm2, %v3027_v10  ;;  %v2907_v58 = vld [vmem:[%s3245_s8 + $0x10] sm:$0xff]  }
 0x554   : > { %v1844_v60 = vpack.c.bf16 %v1745_v59, %v1745_v59  ;;  %v2748_v61 = vpop.f32.mrb[33].mxu1  ;;  %2786 = vmatprep.subr.bf16.mxu0 %v3027_v10  ;;  %v2908_v59 = vld [vmem:[%s3245_s8 + $0x18] sm:$0xff]   ;;  %s3635_s8 = sld [smem:[#allocation6_spill]] }
 0x555   : > { %v1748_v63 = vpop.f32.mrb[34].mxu1 }
 0x556   : > { %v2749_v0 = vpop.f32.mrb[35].mxu1  ;;  %2771 = vmatmul.mubr.msk.bf16.vlgmr.msra.gmra.mrb[40].mxu1 %vm1417_vm3, %v1844_v60  ;;  %v2530_v60 = vld [vmem:[%s684_s6] ss:$0 sm:$0xff] }
 0x557   : > { %2781 = vmatpush3.bf16.msra.mxu1 %v1993_v62  ;;  %2782 = vmatprep.mubr.msk.bf16.mxu1 %vm3028_vm2, %v3027_v10 }
 0x558   : > { %v1791_v2 = vpop.f32.mrb[36].mxu0  ;;  %2794 = vmatprep.subr.bf16.mxu1 %v3027_v10 }
 0x559   : > { %v1845_v3 = vpack.c.bf16 %v1791_v2, %v1791_v2  ;;  %v2754_v4 = vpop.f32.mrb[37].mxu0 }
 0x55a   : > { %v1794_v5 = vpop.f32.mrb[38].mxu0  ;;  %s3639_s26 = sand.u32 1, %s3635_s8  }
 0x55b   : > { %v2755_v6 = vpop.f32.mrb[39].mxu0  ;;  %2777 = vmatmul.mubr.msk.bf16.vlgmr.msra.gmra.mrb[44].mxu0 %vm1417_vm3, %v1845_v3  ;;  %v1837_v7 = vpop.f32.mrb[36].mxu1 }
 0x55c   : > { %v1846_v8 = vpack.c.bf16 %v1837_v7, %v1837_v7  ;;  %v2760_v9 = vpop.f32.mrb[37].mxu1  ;;  %2790 = vmatprep.mubr.msk.bf16.mxu0 %vm3028_vm2, %v3027_v10  ;;  %2787 = vmatpush3.bf16.msra.mxu0 %v2903_v38 }
 0x55d   : > { %v1840_v11 = vpop.f32.mrb[38].mxu1  ;;  %2788 = vmatprep.subr.bf16.mxu0 %v3027_v10 }
 0x55e   : > { %v2761_v12 = vpop.f32.mrb[39].mxu1  ;;  %2783 = vmatmul.mubr.msk.bf16.vlgmr.msra.gmra.mrb[44].mxu1 %vm1417_vm3, %v1846_v8  ;;  %v2534_v8 = vld [vmem:[%s692_s17] ss:$0 sm:$0xff]  ;;  %s2239_s17 = scalar_lea.sflag [#allocation3], %s3639_s26 }
 0x55f   : > { %2802 = vmatprep.mubr.msk.bf16.mxu1 %vm3028_vm2, %v3027_v10  ;;  %2795 = vmatpush3.bf16.msra.mxu1 %v2905_v56 }
 0x560   : > { %2789 = vmatpush3.bf16.msra.mxu0 %v2904_v46  ;;  %2796 = vmatprep.subr.bf16.mxu1 %v3027_v10 }
 0x563   : > { %2797 = vmatpush3.bf16.msra.mxu1 %v2906_v57 }
 0x564   : > { %2798 = vmatprep.subr.bf16.mxu1 %v3027_v10 }
 0x567   : > { %2799 = vmatpush3.bf16.msra.mxu1 %v2907_v58 }
 0x568   : > { %2800 = vmatprep.subr.bf16.mxu1 %v3027_v10 }
 0x56b   : > { %2801 = vmatpush3.bf16.msra.mxu1 %v2908_v59 }
 0x625   : > { %v1891_v13 = vpop.f32.mrb[40].mxu0 }
 0x626   : > { %v2766_v14 = vpop.f32.mrb[41].mxu0  ;;  %v2035_v18 = vsel %vm704_vm1, %v1891_v13, 0.0 }
 0x627   : > { %v1894_v15 = vpop.f32.mrb[42].mxu0 }
 0x628   : > { %v2767_v16 = vpop.f32.mrb[43].mxu0 }
 0x629   : > { %v1937_v17 = vpop.f32.mrb[40].mxu1 }
 0x62a   : > { %v2036_v19 = vsel %vm704_vm1, %v1937_v17, 0.0  ;;  %v2772_v20 = vpop.f32.mrb[41].mxu1 }
 0x62b   : > { %v2037_v21 = vadd.f32 %v2036_v19, %v2035_v18  ;;  %v1940_v22 = vpop.f32.mrb[42].mxu1 }
 0x62c   : > { %v2773_v23 = vpop.f32.mrb[43].mxu1 }
 0x62e   : > { %v1983_v24 = vpop.f32.mrb[44].mxu0 }
 0x62f   : > { %v2038_v25 = vsel %vm704_vm1, %v1983_v24, 0.0  ;;  %v2778_v26 = vpop.f32.mrb[45].mxu0 }
 0x630   : > { %v2039_v27 = vadd.f32 %v2038_v25, %v2037_v21  ;;  %v1986_v28 = vpop.f32.mrb[46].mxu0 }
 0x631   : > { %v2779_v29 = vpop.f32.mrb[47].mxu0  ;;  %v2029_v30 = vpop.f32.mrb[44].mxu1 }
 0x632   : > { %v2040_v31 = vsel %vm704_vm1, %v2029_v30, 0.0  ;;  %v2784_v32 = vpop.f32.mrb[45].mxu1 }
 0x633   : > { %v2041_v33 = vadd.f32 %v2040_v31, %v2039_v27  ;;  %v2032_v34 = vpop.f32.mrb[46].mxu1 }
 0x634   : > { %v2785_v35 = vpop.f32.mrb[47].mxu1 }
 0x635   : > { %v2042_v39 = vadd.f32 %v2041_v33, %v3252_v1 }
 0x637   : > { %v2050_v40 = vadd.f32 %v2527_v36, %v2042_v39 }
 0x639   : > { %v2053_v41 = vsel %vm704_vm1, %v2050_v40, 0.0 }
 0x63a   : > { %2054 = vadd.xlane.f32.xlu0 %v2053_v41 }
 0x6c7   : > { %v2055_v37 = vpop.xlane.xlu0 %2054 }
 0x6c8   : > { %v2056_v42 = vmul.f32 0.03125, %v2055_v37 }
 0x6ca   : > { %v2057_v43 = vsub.f32 %v2050_v40, %v2056_v42 }
 0x6cc   : > { %v2058_v44 = vmul.f32 %v2057_v43, %v2057_v43 }
 0x6ce   : > { %v2059_v45 = vsel %vm704_vm1, %v2058_v44, 0.0 }
 0x6cf   : > { %2060 = vadd.xlane.f32.xlu1 %v2059_v45 }
 0x75c   : > { %v2061_v1 = vpop.xlane.xlu1 %2060 }
 0x75d   : > { %v2062_v47 = vmul.f32 0.03125, %v2061_v1 }
 0x75f   : > { %v2063_v48 = vadd.f32 1e-05, %v2062_v47 }
 0x761   : > { %2927 = vrsqrt.f32 %v2063_v48 }
 0x76b   : > { %v2928_v49 = vpop.eup %2927 }
 0x76c   : > { %v2065_v51 = vmul.f32 %v2928_v49, %v2057_v43 }
 0x76e   : > { %v2072_v53 = vmul.f32 %v2528_v50, %v2065_v51 }
 0x770   : > { %v2079_v54 = vadd.f32 %v2529_v52, %v2072_v53 }
 0x772   : > { %v2080_v55 = vpack.c.bf16 %v2079_v54, %v2079_v54 }
 0x774   : > { %2791 = vmatmul.mubr.msk.bf16.vlgmr.msra.gmra.mrb[48].mxu0 %vm704_vm1, %v2080_v55 }
 0x847   : > { %v2141_v61 = vpop.f32.mrb[48].mxu0 }
 0x848   : > { %v2142_v62 = vadd.f32 %v2530_v60, %v2141_v61  ;;  %v2792_v63 = vpop.f32.mrb[49].mxu0 }
 0x849   : > { %v2144_v0 = vpop.f32.mrb[50].mxu0 }
 0x84a   : > { %v2148_v2 = vmul.f32 0.70710677, %v2142_v62  ;;  %v2793_v3 = vpop.f32.mrb[51].mxu0  ;;  %v2147_v5 = vmul.f32 0.5, %v2142_v62 }
 0x84c   : > { %2929 = verf.f32 %v2148_v2 }
 0x856   : > { %v2930_v4 = vpop.eup %2929 }
 0x857   : > { %v2150_v10 = vadd.f32 1.0, %v2930_v4 }
 0x859   : > { %v2151_v6 = vmul.f32 %v2150_v10, %v2147_v5 }
 0x85b   : > { %v2152_v7 = vpack.c.bf16 %v2151_v6, %v2151_v6 }
 0x85d   : > { %2803 = vmatmul.mubr.msk.bf16.vlgmr.msra.gmra.mrb[48].mxu1 %vm2192_vm5, %v2152_v7 }
 0x930   : > { %v2230_v9 = vpop.f32.mrb[48].mxu1 }
 0x931   : > { %v2231_v11 = vadd.f32 %v2534_v8, %v2230_v9  ;;  %v2804_v12 = vpop.f32.mrb[49].mxu1 }
 0x932   : > { %v2233_v13 = vpop.f32.mrb[50].mxu1 }
 0x933   : > { %v2236_v14 = vadd.f32 %v2231_v11, %v2050_v40  ;;  %v2805_v15 = vpop.f32.mrb[51].mxu1 }
 0x935   : > { %2237 = vst.msk [vmem:[%s3247_s4] sm:$0xff] %vm704_vm1, %v2236_v14 }
 0x936   : > { %2944 = shalt.err (!%p2941_p8)
}
 0x937   : > { %s2945_s4 = scalar_lea.hbm %s3508_s21, 128  ;;  %s2949_s3 = scalar_lea.hbm %s3638_s24, 256 }
 0x938   : > { %p2946_p10 = scmp.ne.s32.totalorder %s3508_s21, %s2945_s4  ;;  %p2950_p13 = scmp.lt.u32.totalorder %s3508_s21, %s3638_s24 }
 0x939   : > { %p2951_p0 = scmp.lt.u32.totalorder %s2949_s3, %s2945_s4  ;;  %p2953_p2 = scmp.lt.u32.totalorder %s2945_s4, %s3508_s21 }
 0x93a   : > { %p2947_p11 = pnand %p2946_p10, %p3154_p3 }
 0x93b   : > { %p2952_p1 = por %p2951_p0, %p2950_p13 }
 0x93c   : > { %p2948_p12 = pneg %p2947_p11 }
 0x93d   : > { %p2954_p4 = por %p2953_p2, %p2952_p1 }
 0x93f   : > { %p2955_p5 = pnand %p2954_p4, %p2948_p12 }
 0x941   : > { %2958 = shalt.err (!%p2955_p5)
}
 0x942   : > { %2806 = dma.vmem_to_hbm [thread:$0]  (%p3154_p3), %s3510_s20, 128, %s3508_s21, %s2239_s17  }
 0x943 PF: > { %s3640_s18 = sld [smem:[#allocation12_spill]]  ;;  %s3641_s8 = sld [smem:[#allocation5_spill]] }
 0x949   : > { %p2812_p6 = scmp.ge.s32.totalorder %s3640_s18, 2  ;;  %s2264_s6 = sand.u32 1, %s3641_s8  }
 0x94a   : > { %s2265_s22 = scalar_lea.sflag [#allocation3], %s2264_s6 }
 0x94b   : > { %p2809_p7 = pnand %p2812_p6, %p3164_p9 }
 0x94d   : > { %2992 = dma.done.wait (!%p2809_p7), %s2265_s22, 128  }
 0x94e   : > { %2994 = vsyncadd (!%p2809_p7), %s2265_s22, 4294967168  ;;  %s27_s20 = sadd.s32 1, %s3640_s18   ;;  %s3643_s29 = sld [smem:[#allocation6_spill]] }
 0x94f   : > { %p24_p8 = scmp.ge.s32.totalorder %s27_s20, 6   ;;  %s3644_s30 = sld [smem:[#allocation7_spill]] }
 0x950   : > { %s3645_s15 = sld [smem:[#allocation17_spill]]  ;;  %s3646_s16 = sld [smem:[#allocation10_spill]] }
 0x951   : > { %s3647_s17 = sld [smem:[#allocation11_spill]]  ;;  %s3648_s18 = sld [smem:[#allocation13_spill]] }
 0x952   : > { %s3649_s19 = sld [smem:[#allocation15_spill]]  ;;  %26 = sbr.rel (!%p24_p8) target bundleno = 14 (0xe), region = 154 }
 0x959   :  { %2270 = vsyncpa [#allocation3], 1 }
 0x95a   :  { %2272 = vsyncpa [#allocation3 + $0x1], 1 }

</bundles_post_ra>
